<compile_context>
chip_gen: v7x
topology: tpu7x:2x2x1
jax: 0.10.0
libtpu: 0.0.40
codegen_flags: <defaults>
</compile_context>

<pallas_src>
import functools

import jax
import jax.numpy as jnp
from jax.experimental import pallas as pl
from jax.experimental.pallas import tpu as pltpu


def _round_up(x, m):
    return ((x + m - 1) // m) * m


# ---------------------------------------------------------------------------
# Kernels
# ---------------------------------------------------------------------------
def _linear_bias_dot_kernel(x_ref, w_ref, b_ref, o_ref):
    """out = bias + x @ w for a single K block (no accumulator round trips).

    Used both for the grid-less whole-array fast path and for the tiled
    single-K path.  Activations are cast to the weight's MXU dtype (bf16 by
    default); the dot accumulates in f32 and all epilogue math stays in f32.
    """
    xv = x_ref[...].astype(w_ref.dtype)
    acc = jnp.dot(xv, w_ref[...], preferred_element_type=jnp.float32)
    o_ref[...] = (acc + b_ref[...]).astype(o_ref.dtype)


def _linear_acc_kernel(x_ref, w_ref, b_ref, o_ref, acc_ref):
    """K-tiled variant: f32 VMEM accumulator, bias folded into the k==0 init."""
    k = pl.program_id(2)

    @pl.when(k == 0)
    def _():
        acc_ref[...] = jnp.broadcast_to(b_ref[...], acc_ref.shape).astype(jnp.float32)

    acc_ref[...] += jnp.dot(
        x_ref[...].astype(w_ref.dtype), w_ref[...],
        preferred_element_type=jnp.float32,
    )

    @pl.when(k == pl.num_programs(2) - 1)
    def _():
        o_ref[...] = acc_ref[...].astype(o_ref.dtype)


# ---------------------------------------------------------------------------
# One-time parameter prep (keep OUT of the hot path)
# ---------------------------------------------------------------------------
def prepare_linear_params(weight, bias, *, compute_dtype=jnp.bfloat16):
    """PyTorch weight [C, H] -> W^T [H, C] in the MXU compute dtype; bias ->
    f32 row vector [1, C].

    bf16 weights halve the bandwidth-bound weight stream on v5e/v6e/v7x; the
    bias / accumulator / epilogue stay f32 (v5e's VPU has no bf16).
    """
    weight_t = jnp.asarray(weight).T.astype(compute_dtype)           # [H, C]
    bias_row = jnp.asarray(bias).astype(jnp.float32).reshape(1, -1)  # [1, C]
    return weight_t, bias_row


# ---------------------------------------------------------------------------
# Wrapper
# ---------------------------------------------------------------------------
_SMALL_PROBLEM_BYTES = 4 * 1024 * 1024  # whole problem in VMEM -> grid-less path


def _vmem_limit_bytes():
    # Budget against the real per-core VMEM (64 MiB on v7x, 128 MiB v5e/v6e).
    try:
        cap = pltpu.get_tpu_info().vmem_capacity_bytes
    except Exception:  # conservative (v7x-sized) fallback
        cap = 64 * 1024 * 1024
    return min(int(0.75 * cap), 100 * 1024 * 1024)


@functools.partial(jax.jit, static_argnames=("tm", "tn", "tk"))
def linear_classifier(x, weight_t, bias_row, *, tm=256, tn=512, tk=1024):
    """x: [B, n_hidden]; weight_t: [n_hidden, n_classes] (pre-transposed,
    MXU dtype); bias_row: [1, n_classes] f32.  Returns x @ W^T + b."""
    B, H = x.shape
    Hw, C = weight_t.shape
    if Hw != H:
        raise ValueError(f"weight_t has hidden dim {Hw}, expected {H}")
    if bias_row.shape != (1, C):
        raise ValueError(f"bias_row must have shape (1, {C}), got {bias_row.shape}")

    flops = 2 * B * H * C
    io_bytes = (x.size * x.dtype.itemsize
                + weight_t.size * weight_t.dtype.itemsize
                + bias_row.size * bias_row.dtype.itemsize
                + B * C * x.dtype.itemsize)

    # ---- Fast path: whole problem in VMEM, no padding, no grid, no slice ----
    if io_bytes + B * C * 4 <= _SMALL_PROBLEM_BYTES:
        return pl.pallas_call(
            _linear_bias_dot_kernel,
            out_shape=jax.ShapeDtypeStruct((B, C), x.dtype),
            cost_estimate=pl.CostEstimate(
                flops=flops, transcendentals=0, bytes_accessed=io_bytes),
        )(x, weight_t, bias_row)

    # ---- General tiled path -------------------------------------------------
    # M (batch): largest candidate tile <= round_up(B, 8) to limit pad waste.
    Mp8 = _round_up(B, 8)
    tm = max(t for t in (_round_up(tm, 8), 512, 256, 128, 64, 32, 16, 8)
             if t <= Mp8)
    Mp = _round_up(Mp8, tm)

    # N (classes): lane-dense tiling when C >= 128; otherwise keep a full-dim
    # (masked-store) output block — cheaper than 8x-padded writes + a slice.
    if C >= 128:
        Np = _round_up(C, 128)
        tn = _round_up(min(tn, Np), 128)
        while Np % tn:
            tn -= 128
    else:
        Np = tn = C

    # K (hidden): single-K whenever it fits one block (no accumulator);
    # otherwise tile with a lane-aligned tk that divides the padded K.
    if H <= tk or (H % 128 != 0 and H <= 4 * tk):
        Kp = tk = H
    else:
        Kp = _round_up(H, 128)
        tk = _round_up(min(tk, Kp), 128)
        while Kp % tk:
            tk -= 128

    # Give v7x's second TensorCore work if both parallel axes collapsed to 1.
    if Mp // tm == 1 and Np // tn == 1 and tm > 8:
        tm = max(8, tm // 2)
        Mp = _round_up(Mp8, tm)

    # Per-call padding is limited to x; weight/bias only pad when the padded
    # extents differ from their true shapes.
    xp = x if (Mp == B and Kp == H) else jnp.pad(x, ((0, Mp - B), (0, Kp - H)))
    # TODO(synk): if the tiled path becomes the production path, hoist these
    # static weight/bias pads into prepare_linear_params as well.
    wp = weight_t if (Kp == H and Np == C) else jnp.pad(
        weight_t, ((0, Kp - H), (0, Np - C)))
    bp = bias_row if Np == C else jnp.pad(bias_row, ((0, 0), (0, Np - C)))

    grid_m, grid_n, grid_k = Mp // tm, Np // tn, Kp // tk
    cost = pl.CostEstimate(
        flops=2 * Mp * Np * Kp,
        transcendentals=0,
        bytes_accessed=(Mp * Kp * xp.dtype.itemsize
                        + Kp * Np * wp.dtype.itemsize
                        + Np * bp.dtype.itemsize
                        + Mp * Np * x.dtype.itemsize),
    )
    vmem_limit = _vmem_limit_bytes()

    if grid_k == 1:
        # Single-K: bias + dot + store; no accumulator scratch, no pl.when.
        out = pl.pallas_call(
            _linear_bias_dot_kernel,
            out_shape=jax.ShapeDtypeStruct((Mp, Np), x.dtype),
            grid_spec=pltpu.PrefetchScalarGridSpec(
                num_scalar_prefetch=0,
                grid=(grid_m, grid_n),
                in_specs=[
                    pl.BlockSpec((tm, Kp), lambda i, j: (i, 0)),
                    pl.BlockSpec((Kp, tn), lambda i, j: (0, j)),
                    pl.BlockSpec((1, tn), lambda i, j: (0, j)),
                ],
                out_specs=pl.BlockSpec((tm, tn), lambda i, j: (i, j)),
            ),
            compiler_params=pltpu.CompilerParams(
                dimension_semantics=("parallel", "parallel"),
                vmem_limit_bytes=vmem_limit,
            ),
            cost_estimate=cost,
        )(xp, wp, bp)
    else:
        out = pl.pallas_call(
            _linear_acc_kernel,
            out_shape=jax.ShapeDtypeStruct((Mp, Np), x.dtype),
            grid_spec=pltpu.PrefetchScalarGridSpec(
                num_scalar_prefetch=0,
                grid=(grid_m, grid_n, grid_k),
                in_specs=[
                    pl.BlockSpec((tm, tk), lambda i, j, k: (i, k)),
                    # Deeper pipelining on the bandwidth-bound weight stream.
                    pl.BlockSpec((tk, tn), lambda i, j, k: (k, j),
                                 pipeline_mode=pl.Buffered(3)),
                    pl.BlockSpec((1, tn), lambda i, j, k: (0, j)),
                ],
                out_specs=pl.BlockSpec((tm, tn), lambda i, j, k: (i, j)),
                scratch_shapes=[pltpu.VMEM((tm, tn), jnp.float32)],
            ),
            compiler_params=pltpu.CompilerParams(
                dimension_semantics=("parallel", "parallel", "arbitrary"),
                vmem_limit_bytes=vmem_limit,
            ),
            cost_estimate=cost,
        )(xp, wp, bp)

    if Mp != B or Np != C:
        out = out[:B, :C]
    return out


if __name__ == "__main__":
    # Small shapes consistent with the module: batch=8, n_hidden=32, n_classes=16.
    B, n_hidden, n_classes = 8, 32, 16

    key = jax.random.PRNGKey(0)
    kx, kw, kb = jax.random.split(key, 3)

    x = jax.random.normal(kx, (B, n_hidden), dtype=jnp.float32)

    # Deterministic parameter init roughly mimicking torch.nn.Linear defaults.
    limit = (1.0 / n_hidden) ** 0.5
    weight = jax.random.uniform(
        kw, (n_classes, n_hidden), minval=-limit, maxval=limit, dtype=jnp.float32)
    bias = jax.random.uniform(
        kb, (n_classes,), minval=-limit, maxval=limit, dtype=jnp.float32)

    # One-time prep (out of the hot path): W -> W^T [H, C] in bf16, bias -> f32 row.
    weight_t, bias_row = prepare_linear_params(weight, bias)

    out = linear_classifier(x, weight_t, bias_row)
    out = jax.block_until_ready(out)

    # Correctness vs. the exact f32 reference (torch module semantics); the
    # tolerance reflects bf16 MXU inputs with f32 accumulation.
    ref = x @ weight.T + bias
    assert out.shape == (B, n_classes)
    assert out.dtype == x.dtype
    err = float(jnp.max(jnp.abs(out - ref)))
    assert jnp.allclose(out, ref, atol=2e-2, rtol=2e-2), f"max abs err {err}"

    print("KERNEL_OK")
</pallas_src>

<mosaic_0001>
module attributes {stable_mosaic.version = 11 : i64} {
  func.func @_linear_bias_dot_kernel(%arg0: memref<8x32xf32, #tpu.memory_space<vmem>>, %arg1: memref<32x16xbf16, #tpu.memory_space<vmem>>, %arg2: memref<1x16xf32, #tpu.memory_space<vmem>>, %arg3: memref<8x16xf32, #tpu.memory_space<vmem>>) attributes {dimension_semantics = [], scalar_prefetch = 0 : i64, scratch_operands = 0 : i64, tpu.core_type = #tpu.core_type<tc>} {
    %c0 = arith.constant 0 : index
    %c0_0 = arith.constant 0 : index
    %0 = vector.load %arg0[%c0, %c0_0] : memref<8x32xf32, #tpu.memory_space<vmem>>, vector<8x32xf32>
    %1 = arith.truncf %0 : vector<8x32xf32> to vector<8x32xbf16>
    %c0_1 = arith.constant 0 : index
    %c0_2 = arith.constant 0 : index
    %2 = vector.load %arg1[%c0_1, %c0_2] : memref<32x16xbf16, #tpu.memory_space<vmem>>, vector<32x16xbf16>
    %cst = arith.constant dense<0.000000e+00> : vector<8x16xf32>
    %3 = tpu.matmul %1, %2, %cst {dimension_numbers = #tpu.dot_dimension_numbers<[1], [0], [0], [1], [0, 0, 1, 1], [], []>} : vector<8x32xbf16>, vector<32x16xbf16>, vector<8x16xf32> -> vector<8x16xf32>
    %c0_3 = arith.constant 0 : index
    %c0_4 = arith.constant 0 : index
    %4 = vector.load %arg2[%c0_3, %c0_4] : memref<1x16xf32, #tpu.memory_space<vmem>>, vector<1x16xf32>
    %5 = vector.broadcast %4 : vector<1x16xf32> to vector<8x16xf32>
    %6 = arith.addf %3, %5 : vector<8x16xf32>
    %c0_5 = arith.constant 0 : index
    %c0_6 = arith.constant 0 : index
    %7 = vector.load %arg3[%c0_5, %c0_6] : memref<8x16xf32, #tpu.memory_space<vmem>>, vector<8x16xf32>
    tpu.vector_store %arg3[%c0_5, %c0_6], %6 {strides = array<i32>} : memref<8x16xf32, #tpu.memory_space<vmem>>, vector<8x16xf32>,
    return
  }
}

</mosaic_0001>

<bundles_post_ra>
// kernel: linear_classifier.1
= control target key start
LH: loop header
LB: loop body
LE: loop exit
PB: predicated region body
PF: predicated region fallthrough
CT: control target
= control target key end

     0   :  { %v145_v1 = vmov 0.0   ;;  %vm146_vm0 = vmmov 0   ;;  %s192_s0 = inlined_call_operand.vmem [shape: f32[8,32], index: 0, kind: input, shape index: {}]   ;;  %s193_s1 = inlined_call_operand.vmem [shape: bf16[32,16], index: 1, kind: input, shape index: {}]   ;;  %s194_s2 = inlined_call_operand.vmem [shape: f32[1,16], index: 2, kind: input, shape index: {}]   ;;  %s195_s3 = inlined_call_operand.hbm [shape: f32[8,16], index: 3, kind: output, shape index: {}]  }
   0x1   :  { %v119_v0 = vld [vmem:[%s193_s1] sm:$0xff]   ;;  %108 = vmatprep.subr.bf16.mxu0 %v145_v1  ;;  %v120_v2 = vld [vmem:[%s193_s1 + $0x8] sm:$0xff]   ;;  %112 = vmatprep.mubr.msk.bf16.mxu0 %vm146_vm0, %v145_v1 }
   0x2   :  { %109 = vmatpush3.bf16.msra.mxu0 %v119_v0  ;;  %v16_v3 = vld [vmem:[%s192_s0] sm:$0xff] }
   0x3   :  { %8 = vsyncpa [#allocation3], 0  ;;  %110 = vmatprep.subr.bf16.mxu0 %v145_v1  ;;  %v17_v4 = vpack.c.bf16 %v16_v3, %v16_v3  ;;  %vm41_vm1 = vcmask 261120   ;;  %v101_v5 = vld [vmem:[%s194_s2] ss:$0 sm:$0xff]  ;;  %s147_s20 = smov [#allocation2]  }
   0x4   :  { %s93_s21 = sshll.u32 %s147_s20, 4  ;;  %vm85_vm2 = vcmask 130048   ;;  %s94_s21 = int_to_ptr.vmem [resolvable:$true] %s93_s21 }
   0x5   :  { %s121_s0 = scalar_lea.vmem %s94_s21, 128  ;;  %p126_p1 = scmp.lt.s32.totalorder %s94_s21, %s94_s21 }
   0x6   :  { %111 = vmatpush3.bf16.msra.mxu0 %v120_v2  ;;  %p122_p0 = scmp.ne.s32.totalorder %s94_s21, %s121_s0  ;;  %p127_p2 = scmp.lt.s32.totalorder %s121_s0, %s121_s0 }
   0x8   :  { %p128_p3 = por %p127_p2, %p126_p1 }
   0x9   :  { %113 = vmatmul.mubr.msk.bf16.vlgmr.msra.gmra.mrb[0].mxu0 %vm41_vm1, %v17_v4 }
   0xa   :  { %p129_p4 = pnand %p128_p3, %p122_p0 }
  0xdc   :  { %v79_v6 = vpop.f32.mrb[0].mxu0 }
  0xdd   :  { %v80_v7 = vadd.f32 %v101_v5, %v79_v6  ;;  %v114_v8 = vpop.f32.mrb[1].mxu0 }
  0xde   :  { %v82_v9 = vpop.f32.mrb[2].mxu0 }
  0xdf   :  { %v115_v10 = vpop.f32.mrb[3].mxu0  ;;  %86 = vst.msk [vmem:[#allocation2] sm:$0xff] %vm85_vm2, %v80_v7 }
  0xe0   :  { %132 = shalt.err (!%p129_p4)
}
  0xe1   :  { %s133_s2 = scalar_lea.hbm %s195_s3, 128 }
  0xe2   :  { %p134_p5 = scmp.ne.s32.totalorder %s195_s3, %s133_s2  ;;  %p137_p6 = scmp.lt.u32.totalorder %s133_s2, %s195_s3 }
  0xe4   :  { %p139_p7 = pnand %p137_p6, %p134_p5 }
  0xe6   :  { %142 = shalt.err (!%p139_p7)
}
  0xe7   :  { %96 = dma.vmem_to_hbm [thread:$0]  %s94_s21, 128, %s195_s3, [#allocation3]  }
  0xe8   :  { %143 = dma.done.wait [#allocation3], 128  }
  0xe9   :  { %144 = vsyncadd [#allocation3], 4294967168 }
  0xea   :  { %100 = vsyncpa [#allocation3], 1 }

</bundles_post_ra>
